<compile_context>
chip_gen: v5e
topology: v5e:2x2
jax: 0.10.0
libtpu: 0.0.40
codegen_flags: <defaults>
</compile_context>

<pallas_src>
import functools

import jax
import jax.numpy as jnp
from jax.experimental import pallas as pl
from jax.experimental.pallas import tpu as pltpu


def _round_up(x, m):
    return ((x + m - 1) // m) * m


def _rmsnorm_kernel(x_ref, w_ref, o_ref, *, eps):
    # x_ref: (tile_rows, E), w_ref: (1, E), o_ref: (tile_rows, E).
    # The hidden dim is never padded, so a plain mean over the lane axis is
    # the true mean over E. Rows of the partial last block that fall past the
    # real array hold garbage, but each row's reduction is independent and
    # Pallas masks their stores, so they cannot contaminate real rows.
    x_fp32 = x_ref[...].astype(jnp.float32)
    ms = jnp.mean(x_fp32 * x_fp32, axis=-1, keepdims=True)
    r_rms = jax.lax.rsqrt(ms + eps)
    # Match torch: normalize in fp32, cast back to the input dtype, then
    # multiply by the weight (result dtype follows x/weight promotion).
    y = (x_fp32 * r_rms).astype(x_ref.dtype) * w_ref[...]
    o_ref[...] = y.astype(o_ref.dtype)


def rmsnorm(x_BTE, weight_E, eps):
    """RMSNorm forward matching the PyTorch module semantics.

    x_BTE: (B, T, E). weight_E: (E,). Returns (B, T, E) with
    dtype = result_type(x.dtype, weight.dtype) (strict torch promotion).
    """
    B, T, E = x_BTE.shape
    rows = B * T
    out_dtype = jnp.result_type(x_BTE.dtype, weight_E.dtype)

    x_bytes = jnp.dtype(x_BTE.dtype).itemsize
    o_bytes = jnp.dtype(out_dtype).itemsize

    # Row alignment follows dtype sublane packing (8 fp32 / 16 bf16 / 32 int8).
    pack = max(1, 4 // x_bytes)
    row_align = 8 * pack

    # ---- tile sizing -------------------------------------------------------
    # ~4 MiB input blocks hit the streaming sweet spot; cap the per-step VMEM
    # footprint (2x double-buffered in + out + ~2 fp32 intermediates) at
    # ~32 MiB so it fits v7x's 64 MiB VMEM with headroom for Mosaic scratch.
    target_in_bytes = 4 * 1024 * 1024
    footprint_per_row = E * (2 * (x_bytes + o_bytes) + 8)
    rows_from_target = target_in_bytes // max(1, E * x_bytes)
    rows_from_vmem = (32 * 1024 * 1024) // max(1, footprint_per_row)
    tile_rows = max(row_align,
                    (min(rows_from_target, rows_from_vmem) // row_align) * row_align)
    # No point in a tile bigger than the (row-aligned) whole tensor.
    tile_rows = min(tile_rows, _round_up(rows, row_align))

    # Prefer an even number of grid steps: dimension_semantics=("parallel",)
    # shards the single grid axis across v7x's two TensorCores; an odd count
    # leaves one core idle for ~1/N of the time. On single-TC v5e/v6e the
    # one extra step costs ~0.35us — negligible.
    steps = pl.cdiv(rows, tile_rows)
    if steps > 1 and steps % 2 == 1:
        tile_rows = max(row_align, _round_up(pl.cdiv(rows, steps + 1), row_align))
        steps = pl.cdiv(rows, tile_rows)

    grid = (steps,)

    # Free reshapes only — no jnp.pad, no post-slice, no extra HBM passes.
    x2d = x_BTE.reshape(rows, E)
    w2d = weight_E.reshape(1, E)

    out2d = pl.pallas_call(
        functools.partial(_rmsnorm_kernel, eps=eps),
        out_shape=jax.ShapeDtypeStruct((rows, E), out_dtype),
        grid_spec=pltpu.PrefetchScalarGridSpec(
            num_scalar_prefetch=0,
            grid=grid,
            in_specs=[
                # Lane extent is the full E (allowed since it equals the array
                # dim); sublane extent tile_rows is a multiple of 8. The last
                # row-block may be partial — Pallas masks its stores.
                pl.BlockSpec((tile_rows, E), lambda i: (i, 0)),
                pl.BlockSpec((1, E), lambda i: (0, 0)),
            ],
            out_specs=pl.BlockSpec((tile_rows, E), lambda i: (i, 0)),
        ),
        compiler_params=pltpu.CompilerParams(
            dimension_semantics=("parallel",),
            vmem_limit_bytes=40 * 1024 * 1024,
        ),
    )(x2d, w2d)

    return out2d.reshape(B, T, E)


def rmsnorm_ref(x_BTE, weight_E, eps):
    x_fp32 = x_BTE.astype(jnp.float32)
    r_rms = jax.lax.rsqrt(jnp.mean(x_fp32 * x_fp32, axis=-1, keepdims=True) + eps)
    return (x_fp32 * r_rms).astype(x_BTE.dtype) * weight_E


if __name__ == "__main__":
    B, T, E = 2, 8, 32
    eps = 1e-5

    key = jax.random.PRNGKey(0)
    x = jax.random.normal(key, (B, T, E), dtype=jnp.float32)
    # nn.Parameter(torch.ones(d_embd)) — deterministic init
    weight = jnp.ones((E,), dtype=jnp.float32)

    y = rmsnorm(x, weight, eps)
    y = jax.block_until_ready(y)

    y_ref = rmsnorm_ref(x, weight, eps)
    assert y.shape == (B, T, E), y.shape
    assert jnp.allclose(y, y_ref, atol=1e-5, rtol=1e-5), "mismatch vs reference"

    print("KERNEL_OK")
</pallas_src>

<mosaic_0001>
module attributes {stable_mosaic.version = 11 : i64} {
  func.func @_rmsnorm_kernel(%arg0: i32, %arg1: memref<16x32xf32, #tpu.memory_space<vmem>>, %arg2: memref<1x32xf32, #tpu.memory_space<vmem>>, %arg3: memref<16x32xf32, #tpu.memory_space<vmem>>) attributes {dimension_semantics = [#tpu.dimension_semantics<parallel>], iteration_bounds = array<i64: 1>, scalar_prefetch = 0 : i64, scratch_operands = 0 : i64, tpu.core_type = #tpu.core_type<tc>, window_params = [{transform_indices = @transform_0, window_bounds = array<i64: 16, 32>}, {pipeline_mode = #tpu.pipeline_mode<synchronous>, transform_indices = @transform_1, window_bounds = array<i64: 1, 32>}, {transform_indices = @transform_2, window_bounds = array<i64: 16, 32>}]} {
    %c0 = arith.constant 0 : index
    %c0_0 = arith.constant 0 : index
    %0 = vector.load %arg1[%c0, %c0_0] : memref<16x32xf32, #tpu.memory_space<vmem>>, vector<16x32xf32>
    %1 = arith.mulf %0, %0 : vector<16x32xf32>
    %cst = arith.constant dense<0.000000e+00> : vector<16xf32>
    %2 = vector.multi_reduction <add>, %1, %cst [1] : vector<16x32xf32> to vector<16xf32>
    %3 = vector.shape_cast %2 : vector<16xf32> to vector<16x1xf32>
    %cst_1 = arith.constant 3.200000e+01 : f32
    %4 = vector.broadcast %cst_1 : f32 to vector<16x1xf32>
    %5 = arith.divf %3, %4 : vector<16x1xf32>
    %cst_2 = arith.constant 9.99999974E-6 : f32
    %6 = vector.broadcast %cst_2 : f32 to vector<16x1xf32>
    %7 = arith.addf %5, %6 : vector<16x1xf32>
    %8 = math.rsqrt %7 : vector<16x1xf32>
    %9 = vector.broadcast %8 : vector<16x1xf32> to vector<16x32xf32>
    %10 = arith.mulf %0, %9 : vector<16x32xf32>
    %c0_3 = arith.constant 0 : index
    %c0_4 = arith.constant 0 : index
    %11 = vector.load %arg2[%c0_3, %c0_4] : memref<1x32xf32, #tpu.memory_space<vmem>>, vector<1x32xf32>
    %12 = vector.broadcast %11 : vector<1x32xf32> to vector<16x32xf32>
    %13 = arith.mulf %10, %12 : vector<16x32xf32>
    %c0_5 = arith.constant 0 : index
    %c0_6 = arith.constant 0 : index
    %14 = vector.load %arg3[%c0_5, %c0_6] : memref<16x32xf32, #tpu.memory_space<vmem>>, vector<16x32xf32>
    tpu.vector_store %arg3[%c0_5, %c0_6], %13 {strides = array<i32>} : memref<16x32xf32, #tpu.memory_space<vmem>>, vector<16x32xf32>,
    return
  }
  func.func @transform_0(%arg0: i32) -> (i32, i32) {
    %c0_i32 = arith.constant 0 : i32
    %c0_i32_0 = arith.constant 0 : i32
    return %arg0, %c0_i32 : i32, i32
  }
  func.func @transform_1(%arg0: i32) -> (i32, i32) {
    %c0_i32 = arith.constant 0 : i32
    %c0_i32_0 = arith.constant 0 : i32
    %c0_i32_1 = arith.constant 0 : i32
    return %c0_i32, %c0_i32_0 : i32, i32
  }
  func.func @transform_2(%arg0: i32) -> (i32, i32) {
    %c0_i32 = arith.constant 0 : i32
    %c0_i32_0 = arith.constant 0 : i32
    return %arg0, %c0_i32 : i32, i32
  }
}

</mosaic_0001>

<bundles_post_ra>
// kernel: tpu_custom_call.1
= control target key start
LH: loop header
LB: loop body
LE: loop exit
PB: predicated region body
PF: predicated region fallthrough
CT: control target
= control target key end

     0   :  { %7 = vsyncpa [#allocation3], 0  ;;  %s245_s0 = inlined_call_operand.hbm [shape: f32[16,32], index: 0, kind: input, shape index: {}]   ;;  %s246_s1 = inlined_call_operand.hbm [shape: f32[1,32], index: 1, kind: input, shape index: {}]   ;;  %s247_s2 = inlined_call_operand.hbm [shape: f32[16,32], index: 2, kind: output, shape index: {}]  }
   0x1   :  { %8 = vsyncpa [#allocation6], 0 }
   0x2   :  { %9 = vsyncpa [#allocation4], 0  ;;  %s14_s11 = sshll.u32 %s245_s0, 4  ;;  %s205_s12 = smov [#allocation2]   ;;  %s15_s11 = int_to_ptr.hbm [resolvable:$true] %s14_s11 }
   0x3   :  { %s16_s13 = sshll.u32 %s205_s12, 4  ;;  %s28_s16 = sshll.u32 %s246_s1, 4  ;;  %s17_s13 = int_to_ptr.vmem [resolvable:$true] %s16_s13  ;;  %s29_s16 = int_to_ptr.hbm [resolvable:$true] %s28_s16 }
   0x4   :  { %s206_s17 = smov 128   ;;  %s207_s18 = smov 8  }
   0x5   :  { %22 = dma.hbm_to_vmem [thread:$0]  %s15_s11, 256, %s17_s13, [#allocation3], %s206_s17, %s206_s17, %s207_s18  }
   0x6   :  { %s208_s19 = smov [#allocation5]  }
   0x7   :  { %s30_s20 = sshll.u32 %s208_s19, 4  ;;  %s31_s20 = int_to_ptr.vmem [resolvable:$true] %s30_s20 }
   0x8   :  { %33 = dma.hbm_to_vmem [thread:$0]  %s29_s16, 16, %s31_s20, [#allocation6]  }
   0x9   :  { %199 = dma.done.wait [#allocation3], 256  }
   0xa   :  { %200 = vsyncadd [#allocation3], 4294967040 }
   0xb   :  { %201 = dma.done.wait [#allocation6], 16  }
   0xc   :  { %202 = vsyncadd [#allocation6], 4294967280  ;;  %v42_v0 = vld [vmem:[#allocation2] sm:$0xff]  ;;  %vm46_vm0 = vcmask 261120   ;;  %v43_v2 = vld [vmem:[#allocation2 + $0x8] sm:$0xff]  ;;  %v209_v6 = vmov 32.0  }
   0xd   :  { %v44_v1 = vmul.f32 %v42_v0, %v42_v0  ;;  %v45_v4 = vmul.f32 %v43_v2, %v43_v2  ;;  %121 = vrcp.f32 %v209_v6  ;;  %v120_v27 = vld [vmem:[#allocation5] ss:$0 sm:$0xff]  ;;  %s210_s0 = smov [#allocation7]   ;;  %s100_s23 = sshll.u32 %s247_s2, 4  ;;  %s101_s23 = int_to_ptr.hbm [resolvable:$true] %s100_s23 }
   0xe   :  { %s98_s1 = sshll.u32 %s210_s0, 4  ;;  %s99_s1 = int_to_ptr.vmem [resolvable:$true] %s98_s1 }
   0xf   :  { %v47_v3 = vsel %vm46_vm0, %v44_v1, 0.0  ;;  %v50_v5 = vsel %vm46_vm0, %v45_v4, 0.0 }
  0x10   :  { %48 = vadd.xlane.f32.xlu0 %v47_v3 }
  0x13   :  { %v122_v7 = vpop.eup %121 }
  0x14   :  { %v54_v8 = vmul.f32 32.0, %v122_v7  ;;  %vm58_vm1 = vweird.f32 %v122_v7 }
  0x16   :  { %v55_v9 = vsub.f32 1.0, %v54_v8 }
  0x18   :  { %51 = vadd.xlane.f32.xlu0 %v50_v5  ;;  %v56_v10 = vmul.f32 %v122_v7, %v55_v9 }
  0x1a   :  { %v57_v11 = vadd.f32 %v122_v7, %v56_v10 }
  0x1c   :  { %v59_v12 = vsel %vm58_vm1, %v122_v7, %v57_v11 }
  0x83   :  { %v49_v13 = vpop.xlane.xlu0 %48 }
  0x84   :  { %v60_v14 = vmul.f32 %v59_v12, %v49_v13 }
  0x86   :  { %v62_v15 = vadd.f32 1e-05, %v60_v14 }
  0x88   :  { %123 = vrsqrt.f32 %v62_v15  ;;  %vm70_vm3 = vweird.f32 %v62_v15 }
  0x8b   :  { %v52_v16 = vpop.xlane.xlu0 %51 }
  0x8c   :  { %v61_v17 = vmul.f32 %v59_v12, %v52_v16 }
  0x8e   :  { %v124_v18 = vpop.eup %123  ;;  %v63_v19 = vadd.f32 1e-05, %v61_v17 }
  0x8f   :  { %v65_v20 = vmul.f32 %v124_v18, %v62_v15  ;;  %vm71_vm2 = vweird.f32 %v124_v18 }
  0x90   :  { %125 = vrsqrt.f32 %v63_v19  ;;  %vm72_vm4 = vmor %vm70_vm3, %vm71_vm2  ;;  %vm80_vm6 = vweird.f32 %v63_v19 }
  0x91   :  { %v66_v21 = vmul.f32 %v124_v18, %v65_v20 }
  0x93   :  { %v67_v22 = vmul.f32 0.5, %v66_v21 }
  0x95   :  { %v68_v23 = vsub.f32 1.5, %v67_v22 }
  0x96   :  { %v126_v24 = vpop.eup %125 }
  0x97   :  { %v69_v25 = vmul.f32 %v124_v18, %v68_v23  ;;  %v75_v26 = vmul.f32 %v126_v24, %v63_v19  ;;  %vm81_vm5 = vweird.f32 %v126_v24 }
  0x98   :  { %vm82_vm7 = vmor %vm80_vm6, %vm81_vm5 }
  0x99   :  { %v73_v28 = vsel %vm72_vm4, %v124_v18, %v69_v25  ;;  %v76_v29 = vmul.f32 %v126_v24, %v75_v26 }
  0x9a   :  { %v84_v30 = vmul.f32 %v73_v28, %v42_v0 }
  0x9b   :  { %v77_v31 = vmul.f32 0.5, %v76_v29 }
  0x9c   :  { %v90_v32 = vmul.f32 %v120_v27, %v84_v30 }
  0x9d   :  { %v78_v33 = vsub.f32 1.5, %v77_v31 }
  0x9e   :  { %92 = vst.msk [vmem:[#allocation7] sm:$0xff] %vm46_vm0, %v90_v32 }
  0x9f   :  { %v79_v34 = vmul.f32 %v126_v24, %v78_v33 }
  0xa1   :  { %v83_v35 = vsel %vm82_vm7, %v126_v24, %v79_v34 }
  0xa2   :  { %v85_v36 = vmul.f32 %v83_v35, %v43_v2 }
  0xa4   :  { %v91_v37 = vmul.f32 %v120_v27, %v85_v36 }
  0xa6   :  { %93 = vst.msk [vmem:[#allocation7 + $0x8] sm:$0xff] %vm46_vm0, %v91_v37 }
  0xa7   :  { %106 = dma.vmem_to_hbm [thread:$0]  %s99_s1, 256, %s101_s23, [#allocation4], %s206_s17, %s206_s17, %s207_s18  }
  0xa8   :  { %203 = dma.done.wait [#allocation4], 256  }
  0xa9   :  { %204 = vsyncadd [#allocation4], 4294967040 }
  0xaa   :  { %111 = vsyncpa [#allocation3], 1 }
  0xab   :  { %112 = vsyncpa [#allocation6], 1 }
  0xac   :  { %113 = vsyncpa [#allocation4], 1 }

</bundles_post_ra>
